<compile_context>
chip_gen: v7x
topology: tpu7x:2x2x1
jax: 0.10.0
libtpu: 0.0.40
codegen_flags: <defaults>
</compile_context>

<pallas_src>
import jax
import jax.numpy as jnp
from jax import lax
from jax.experimental import pallas as pl
from jax.experimental.pallas import tpu as pltpu


# ----------------------------- Pallas kernel --------------------------------

def _mlp_l2norm_t_kernel(xt_ref, w1_ref, b1_ref, w2_ref, b2_ref, o_ref):
    """One column-tile of: l2norm(Linear2(ReLU(Linear1(x))))^T.

    xt_ref : (C, R)   — patches on the lane axis (R = row_tile, multiple of 128)
    w1_ref : (NC, C)  — PyTorch nn.Linear layout (out, in)
    b1_ref : (NC, 1)
    w2_ref : (NC, NC)
    b2_ref : (NC, 1)
    o_ref  : (NC, R)  — lane-dense output
    """
    xt = xt_ref[...].astype(jnp.float32)

    # Linear 1 + ReLU   (MXU matmul, f32 accumulate)
    h = jnp.dot(w1_ref[...], xt, preferred_element_type=jnp.float32)
    h = jnp.maximum(h + b1_ref[...], 0.0)

    # Linear 2
    y = jnp.dot(w2_ref[...], h, preferred_element_type=jnp.float32)
    y = y + b2_ref[...]

    # Normalize(power=2): norm = sqrt(sum((y + 1e-7)^2, channel axis)); y / norm.
    # Channel axis is the sublane axis (axis 0); rsqrt -> EUP, mul -> VPU.
    eps_shifted = y + 1e-7
    inv_norm = lax.rsqrt(jnp.sum(eps_shifted * eps_shifted, axis=0, keepdims=True))
    o_ref[...] = (y * inv_norm).astype(o_ref.dtype)


def _round_up(x, m):
    return ((x + m - 1) // m) * m


def _choose_row_tile(n, max_row_tile=512):
    """Tile over the patch (lane) axis.

    Multiple of 128 (lane width), capped at max_row_tile, and when there is
    enough work the tile is chosen so the grid has >= 2 steps (megacore).
    """
    if n <= 128:
        return 128
    if n <= 2 * max_row_tile:
        return _round_up(pl.cdiv(n, 2), 128)
    return max_row_tile


def mlp_l2norm_t(xt, w1, b1, w2, b2, *, max_row_tile=512):
    """xt: (C, N) f32; w1: (NC, C); b1: (NC,); w2: (NC, NC); b2: (NC,).

    Returns (NC, N): l2-normalized MLP output, transposed (patches on lanes).
    """
    c, n = xt.shape
    nc = w1.shape[0]

    row_tile = _choose_row_tile(n, max_row_tile)
    grid_n = pl.cdiv(n, row_tile)
    n_pad = grid_n * row_tile
    if n_pad != n:
        xt = jnp.pad(xt, ((0, 0), (0, n_pad - n)))

    b1_2d = b1.reshape(nc, 1)
    b2_2d = b2.reshape(nc, 1)

    out = pl.pallas_call(
        _mlp_l2norm_t_kernel,
        out_shape=jax.ShapeDtypeStruct((nc, n_pad), jnp.float32),
        grid_spec=pltpu.PrefetchScalarGridSpec(
            num_scalar_prefetch=0,
            grid=(grid_n,),
            in_specs=[
                pl.BlockSpec((c, row_tile), lambda i: (0, i)),   # x^T tile
                pl.BlockSpec((nc, c), lambda i: (0, 0)),         # W1 (resident)
                pl.BlockSpec((nc, 1), lambda i: (0, 0)),         # b1
                pl.BlockSpec((nc, nc), lambda i: (0, 0)),        # W2 (resident)
                pl.BlockSpec((nc, 1), lambda i: (0, 0)),         # b2
            ],
            out_specs=pl.BlockSpec((nc, row_tile), lambda i: (0, i)),
        ),
        compiler_params=pltpu.CompilerParams(
            dimension_semantics=("parallel",)),
    )(xt, w1, b1_2d, w2, b2_2d)

    return out[:, :n]


# ----------------------------- Module wrapper --------------------------------

class PatchSampleF:
    """JAX/Pallas port of PatchSampleF (use_mlp=True, init_type='normal')."""

    def __init__(self, nc=256, init_gain=0.02, use_mlp=True, seed=0):
        self.nc = nc
        self.init_gain = init_gain
        self.use_mlp = use_mlp
        self.mlp_init = False
        self.mlps = []
        self._seed = seed

    def create_mlp(self, feats):
        key = jax.random.PRNGKey(self._seed)
        for feat in feats:
            input_nc = feat.shape[1]           # NCHW -> channels
            key, k1, k2 = jax.random.split(key, 3)
            # init_weights(init_type='normal'): W ~ N(0, init_gain), b = 0.
            # Weights stored in PyTorch nn.Linear layout (out, in).
            w1 = self.init_gain * jax.random.normal(k1, (self.nc, input_nc), jnp.float32)
            b1 = jnp.zeros((self.nc,), jnp.float32)
            w2 = self.init_gain * jax.random.normal(k2, (self.nc, self.nc), jnp.float32)
            b2 = jnp.zeros((self.nc,), jnp.float32)
            self.mlps.append((w1, b1, w2, b2))
        self.mlp_init = True

    def __call__(self, feats, num_patches=64, patch_ids=None, rng=None):
        # TODO(synk): feature maps with matching (or padded) C could be
        # concatenated into a single pallas_call to amortize launch overhead.
        return_ids = []
        return_feats = []
        if self.use_mlp and not self.mlp_init:
            self.create_mlp(feats)
        if rng is None:
            rng = jax.random.PRNGKey(123)

        for feat_id, feat in enumerate(feats):
            B, C, H, W = feat.shape
            # Gather straight from NCHW: only B*P*C values touched, no full
            # NHWC transpose of the whole feature map.
            feat_flat = feat.reshape(B, C, H * W)

            if num_patches > 0:
                if patch_ids is not None:
                    patch_id = patch_ids[feat_id]
                else:
                    rng, sub = jax.random.split(rng)
                    perm = jax.random.permutation(sub, H * W)
                    patch_id = perm[: min(num_patches, H * W)]
                patch_id = jnp.asarray(patch_id, dtype=jnp.int32)
                x_g = jnp.take(feat_flat, patch_id, axis=2)      # (B, C, P)
            else:
                x_g = feat_flat                                  # (B, C, H*W)
                patch_id = jnp.zeros((0,), jnp.int32)

            P = x_g.shape[2]
            # Columns ordered b*P + p, matching PyTorch's flatten(0, 1).
            xt = jnp.transpose(x_g, (1, 0, 2)).reshape(C, B * P)  # (C, N)

            if self.use_mlp:
                w1, b1, w2, b2 = self.mlps[feat_id]
                yt = mlp_l2norm_t(xt, w1, b1, w2, b2)             # (nc, N)
            else:
                # TODO(synk): l2norm-only path kept in plain JAX (module
                # defaults to use_mlp=True).
                eps_shifted = xt + 1e-7
                yt = xt * lax.rsqrt(
                    jnp.sum(eps_shifted * eps_shifted, axis=0, keepdims=True))

            x_sample = jnp.transpose(yt, (1, 0))                  # (N, out_c)

            return_ids.append(patch_id)
            if num_patches == 0:
                x_sample = jnp.transpose(
                    x_sample.reshape(B, H, W, x_sample.shape[-1]), (0, 3, 1, 2))
            return_feats.append(x_sample)
        return return_feats, return_ids


# ----------------------------- Reference check --------------------------------

def _reference_forward(feat, patch_id, w1, b1, w2, b2):
    """Pure-JAX replica of the PyTorch path (full transpose + gather + MLP)."""
    B, C, H, W = feat.shape
    fr = jnp.transpose(feat, (0, 2, 3, 1)).reshape(B, H * W, C)
    xs = fr[:, patch_id, :].reshape(-1, C)
    h = jnp.maximum(xs @ w1.T + b1, 0.0)
    y = h @ w2.T + b2
    norm = jnp.sqrt(jnp.sum((y + 1e-7) ** 2, axis=-1, keepdims=True))
    return y / norm


if __name__ == "__main__":
    key = jax.random.PRNGKey(0)
    k_a, k_b = jax.random.split(key)

    # Two feature maps (NCHW), as the module takes a list of feats.
    feat_a = jax.random.normal(k_a, (2, 4, 16, 16), jnp.float32)
    feat_b = jax.random.normal(k_b, (2, 8, 8, 8), jnp.float32)
    feats = [feat_a, feat_b]

    model = PatchSampleF(nc=32, init_gain=0.02, use_mlp=True, seed=0)
    out_feats, out_ids = model(feats, num_patches=8)

    for o in out_feats:
        jax.block_until_ready(o)

    # Sanity: compare kernel output vs pure-JAX reference on the same patches.
    for feat_id, feat in enumerate(feats):
        B, C, H, W = feat.shape
        w1, b1, w2, b2 = model.mlps[feat_id]
        ref = _reference_forward(feat, out_ids[feat_id], w1, b1, w2, b2)
        assert out_feats[feat_id].shape == (B * 8, 32)
        assert jnp.allclose(out_feats[feat_id], ref, atol=1e-5, rtol=1e-5)

    print("KERNEL_OK")
</pallas_src>

<mosaic_0001>
module attributes {stable_mosaic.version = 11 : i64} {
  func.func @_mlp_l2norm_t_kernel(%arg0: i32, %arg1: memref<4x128xf32, #tpu.memory_space<vmem>>, %arg2: memref<32x4xf32, #tpu.memory_space<vmem>>, %arg3: memref<32x1xf32, #tpu.memory_space<vmem>>, %arg4: memref<32x32xf32, #tpu.memory_space<vmem>>, %arg5: memref<32x1xf32, #tpu.memory_space<vmem>>, %arg6: memref<32x128xf32, #tpu.memory_space<vmem>>) attributes {dimension_semantics = [#tpu.dimension_semantics<parallel>], iteration_bounds = array<i64: 1>, scalar_prefetch = 0 : i64, scratch_operands = 0 : i64, tpu.core_type = #tpu.core_type<tc>, window_params = [{transform_indices = @transform_0, window_bounds = array<i64: 4, 128>}, {pipeline_mode = #tpu.pipeline_mode<synchronous>, transform_indices = @transform_1, window_bounds = array<i64: 32, 4>}, {pipeline_mode = #tpu.pipeline_mode<synchronous>, transform_indices = @transform_2, window_bounds = array<i64: 32, 1>}, {pipeline_mode = #tpu.pipeline_mode<synchronous>, transform_indices = @transform_3, window_bounds = array<i64: 32, 32>}, {pipeline_mode = #tpu.pipeline_mode<synchronous>, transform_indices = @transform_4, window_bounds = array<i64: 32, 1>}, {transform_indices = @transform_5, window_bounds = array<i64: 32, 128>}]} {
    %c0 = arith.constant 0 : index
    %c0_0 = arith.constant 0 : index
    %0 = vector.load %arg1[%c0, %c0_0] : memref<4x128xf32, #tpu.memory_space<vmem>>, vector<4x128xf32>
    %c0_1 = arith.constant 0 : index
    %c0_2 = arith.constant 0 : index
    %1 = vector.load %arg2[%c0_1, %c0_2] : memref<32x4xf32, #tpu.memory_space<vmem>>, vector<32x4xf32>
    %cst = arith.constant dense<0.000000e+00> : vector<32x128xf32>
    %2 = tpu.matmul %1, %0, %cst {dimension_numbers = #tpu.dot_dimension_numbers<[1], [0], [0], [1], [0, 0, 1, 1], [], []>} : vector<32x4xf32>, vector<4x128xf32>, vector<32x128xf32> -> vector<32x128xf32>
    %c0_3 = arith.constant 0 : index
    %c0_4 = arith.constant 0 : index
    %3 = vector.load %arg3[%c0_3, %c0_4] : memref<32x1xf32, #tpu.memory_space<vmem>>, vector<32x1xf32>
    %4 = vector.broadcast %3 : vector<32x1xf32> to vector<32x128xf32>
    %5 = arith.addf %2, %4 : vector<32x128xf32>
    %cst_5 = arith.constant 0.000000e+00 : f32
    %6 = vector.broadcast %cst_5 : f32 to vector<32x128xf32>
    %7 = arith.maximumf %5, %6 : vector<32x128xf32>
    %c0_6 = arith.constant 0 : index
    %c0_7 = arith.constant 0 : index
    %8 = vector.load %arg4[%c0_6, %c0_7] : memref<32x32xf32, #tpu.memory_space<vmem>>, vector<32x32xf32>
    %cst_8 = arith.constant dense<0.000000e+00> : vector<32x128xf32>
    %9 = tpu.matmul %8, %7, %cst_8 {dimension_numbers = #tpu.dot_dimension_numbers<[1], [0], [0], [1], [0, 0, 1, 1], [], []>} : vector<32x32xf32>, vector<32x128xf32>, vector<32x128xf32> -> vector<32x128xf32>
    %c0_9 = arith.constant 0 : index
    %c0_10 = arith.constant 0 : index
    %10 = vector.load %arg5[%c0_9, %c0_10] : memref<32x1xf32, #tpu.memory_space<vmem>>, vector<32x1xf32>
    %11 = vector.broadcast %10 : vector<32x1xf32> to vector<32x128xf32>
    %12 = arith.addf %9, %11 : vector<32x128xf32>
    %cst_11 = arith.constant 1.000000e-07 : f32
    %13 = vector.broadcast %cst_11 : f32 to vector<32x128xf32>
    %14 = arith.addf %12, %13 : vector<32x128xf32>
    %15 = arith.mulf %14, %14 : vector<32x128xf32>
    %cst_12 = arith.constant dense<0.000000e+00> : vector<128xf32>
    %16 = vector.multi_reduction <add>, %15, %cst_12 [0] : vector<32x128xf32> to vector<128xf32>
    %17 = vector.shape_cast %16 : vector<128xf32> to vector<1x128xf32>
    %18 = math.rsqrt %17 : vector<1x128xf32>
    %19 = vector.broadcast %18 : vector<1x128xf32> to vector<32x128xf32>
    %20 = arith.mulf %12, %19 : vector<32x128xf32>
    %c0_13 = arith.constant 0 : index
    %c0_14 = arith.constant 0 : index
    %21 = vector.load %arg6[%c0_13, %c0_14] : memref<32x128xf32, #tpu.memory_space<vmem>>, vector<32x128xf32>
    tpu.vector_store %arg6[%c0_13, %c0_14], %20 {strides = array<i32>} : memref<32x128xf32, #tpu.memory_space<vmem>>, vector<32x128xf32>,
    return
  }
  func.func @transform_0(%arg0: i32) -> (i32, i32) {
    %c0_i32 = arith.constant 0 : i32
    %c0_i32_0 = arith.constant 0 : i32
    return %c0_i32, %arg0 : i32, i32
  }
  func.func @transform_1(%arg0: i32) -> (i32, i32) {
    %c0_i32 = arith.constant 0 : i32
    %c0_i32_0 = arith.constant 0 : i32
    %c0_i32_1 = arith.constant 0 : i32
    return %c0_i32, %c0_i32_0 : i32, i32
  }
  func.func @transform_2(%arg0: i32) -> (i32, i32) {
    %c0_i32 = arith.constant 0 : i32
    %c0_i32_0 = arith.constant 0 : i32
    %c0_i32_1 = arith.constant 0 : i32
    return %c0_i32, %c0_i32_0 : i32, i32
  }
  func.func @transform_3(%arg0: i32) -> (i32, i32) {
    %c0_i32 = arith.constant 0 : i32
    %c0_i32_0 = arith.constant 0 : i32
    %c0_i32_1 = arith.constant 0 : i32
    return %c0_i32, %c0_i32_0 : i32, i32
  }
  func.func @transform_4(%arg0: i32) -> (i32, i32) {
    %c0_i32 = arith.constant 0 : i32
    %c0_i32_0 = arith.constant 0 : i32
    %c0_i32_1 = arith.constant 0 : i32
    return %c0_i32, %c0_i32_0 : i32, i32
  }
  func.func @transform_5(%arg0: i32) -> (i32, i32) {
    %c0_i32 = arith.constant 0 : i32
    %c0_i32_0 = arith.constant 0 : i32
    return %c0_i32, %arg0 : i32, i32
  }
}

</mosaic_0001>

<bundles_post_ra>
// kernel: tpu_custom_call.1
= control target key start
LH: loop header
LB: loop body
LE: loop exit
PB: predicated region body
PF: predicated region fallthrough
CT: control target
= control target key end

     0   :  { %vm63_vm0 = vcmask 1043456   ;;  %vm50_vm1 = vcmask 31744   ;;  %v412_v5 = vmov 0   ;;  %s517_s0 = inlined_call_operand.vmem [shape: f32[4,128], index: 0, kind: input, shape index: {}]   ;;  %s518_s1 = inlined_call_operand.vmem [shape: f32[32,4], index: 1, kind: input, shape index: {}]   ;;  %s519_s2 = inlined_call_operand.vmem [shape: f32[32,1], index: 2, kind: input, shape index: {}]   ;;  %s520_s3 = inlined_call_operand.vmem [shape: f32[32,32], index: 3, kind: input, shape index: {}]   ;;  %s521_s4 = inlined_call_operand.vmem [shape: f32[32,1], index: 4, kind: input, shape index: {}]   ;;  %s522_s5 = inlined_call_operand.hbm [shape: f32[32,128], index: 5, kind: output, shape index: {}]  }
   0x1   :  { %v21_v0 = vld [vmem:[%s517_s0] sm:$0xf]  ;;  %v23_v2 = vld [vmem:[%s518_s1 + $0x8] sm:$0xff]  ;;  %v24_v3 = vld [vmem:[%s518_s1 + $0x10] sm:$0xff]  ;;  %384 = vset.pattern.permute.xlu0 %v412_v5  ;;  %385 = vset.pattern.permute.xlu1 %v412_v5 }
   0x2   :  { %v22_v1 = vld [vmem:[%s518_s1] sm:$0xff]  ;;  %346 = vmatprep.subr.msk.mxu0 %vm63_vm0, %v21_v0  ;;  %v28_v6 = vld [vmem:[%s519_s2 + $0x10] sm:$0xff]  ;;  %v25_v7 = vld [vmem:[%s518_s1 + $0x18] sm:$0xff] }
   0x3   :  { %348 = vmatprep.mubr.msk.f32.mxu0 %vm50_vm1, %v22_v1  ;;  %v26_v4 = vld [vmem:[%s519_s2] sm:$0xff]  ;;  %347 = vmatpush3.msk.msra.mxu0 %vm63_vm0, %v21_v0  ;;  %v27_v8 = vld [vmem:[%s519_s2 + $0x8] sm:$0xff] }
   0x4   :  { %349 = vmatmul.mubr.msk.f32.vlgmr.msra.gmra.mrb[0].mxu0 %vm50_vm1, %v23_v2  ;;  %32 = vperm.xlu0 %384, %v26_v4  }
   0x5   :  { %351 = vmatprep.mubr.msk.f32.mxu0 %vm50_vm1, %v24_v3 }
   0x6   :  { %10 = vsyncpa [#allocation3], 0  ;;  %42 = vperm.xlu1 %385, %v28_v6   ;;  %v29_v9 = vld [vmem:[%s519_s2 + $0x18] sm:$0xff]  ;;  %v160_v10 = vld [vmem:[%s521_s4] sm:$0xff]  ;;  %vm184_vm2 = vcmask 261120  }
   0x7   :  { %v161_v11 = vld [vmem:[%s521_s4 + $0x8] sm:$0xff]  ;;  %v162_v12 = vld [vmem:[%s521_s4 + $0x10] sm:$0xff]  ;;  %v163_v13 = vld [vmem:[%s521_s4 + $0x18] sm:$0xff] }
   0x8   :  { %352 = vmatmul.mubr.msk.f32.gmra.mrb[2].mxu0 %vm50_vm1, %v25_v7  ;;  %37 = vperm.xlu0 %384, %v27_v8   ;;  %v156_v14 = vld [vmem:[%s520_s3] sm:$0xff]  ;;  %v158_v15 = vld [vmem:[%s520_s3 + $0x10] sm:$0xff]  ;;  %v157_v34 = vld [vmem:[%s520_s3 + $0x8] sm:$0xff] }
   0x9   :  { %362 = vmatprep.mubr.msk.f32.mxu0 %vm184_vm2, %v156_v14  ;;  %365 = vmatprep.mubr.msk.f32.mxu1 %vm184_vm2, %v158_v15  ;;  %v159_v35 = vld [vmem:[%s520_s3 + $0x18] sm:$0xff]  ;;  %s413_s3 = smov [#allocation2]  }
   0xa   :  { %47 = vperm.xlu1 %385, %v29_v9   ;;  %s313_s23 = sshll.u32 %s413_s3, 4  ;;  %s314_s23 = int_to_ptr.vmem [resolvable:$true] %s313_s23 }
   0xb   :  { %s388_s24 = scalar_lea.vmem %s314_s23, 512  ;;  %p393_p1 = scmp.lt.s32.totalorder %s314_s23, %s314_s23 }
   0xc   :  { %166 = vperm.xlu0 %384, %v160_v10   ;;  %p389_p0 = scmp.ne.s32.totalorder %s314_s23, %s388_s24  ;;  %p394_p2 = scmp.lt.s32.totalorder %s388_s24, %s388_s24 }
   0xe   :  { %171 = vperm.xlu1 %385, %v161_v11   ;;  %p395_p3 = por %p394_p2, %p393_p1 }
  0x10   :  { %176 = vperm.xlu0 %384, %v162_v12   ;;  %p396_p4 = pnand %p395_p3, %p389_p0 }
  0x12   :  { %181 = vperm.xlu1 %385, %v163_v13  }
  0x83   :  { %v33_v16 = vpop.permute.xlu0 %32 }
  0x85   :  { %v43_v17 = vpop.permute.xlu1 %42 }
  0x87   :  { %v38_v18 = vpop.permute.xlu0 %37 }
  0x89   :  { %v48_v24 = vpop.permute.xlu1 %47 }
  0x8b   :  { %v167_v36 = vpop.permute.xlu0 %166 }
  0x8d   :  { %v172_v37 = vpop.permute.xlu1 %171 }
  0x8f   :  { %v177_v38 = vpop.permute.xlu0 %176 }
  0x91   :  { %v182_v39 = vpop.permute.xlu1 %181 }
  0xd7   :  { %v350_v19 = vpop.f32.mrb[0].mxu0 }
  0xd8   :  { %v139_v20 = vadd.f32 %v350_v19, %v38_v18  ;;  %v133_v21 = vpop.f32.mrb[1].mxu0 }
  0xd9   :  { %v134_v22 = vadd.f32 %v133_v21, %v33_v16 }
  0xda   :  { %v153_v23 = vmax.f32 %v139_v20, 0.0 }
  0xdb   :  { %v152_v25 = vmax.f32 %v134_v22, 0.0  ;;  %v353_v26 = vpop.f32.mrb[2].mxu0 }
  0xdc   :  { %v149_v27 = vadd.f32 %v353_v26, %v48_v24  ;;  %v143_v28 = vpop.f32.mrb[3].mxu0 }
  0xdd   :  { %v368_v29 = vpack.c.bf16 %v153_v23, %v152_v25  ;;  %v144_v30 = vadd.f32 %v143_v28, %v43_v17 }
  0xde   :  { %v155_v31 = vmax.f32 %v149_v27, 0.0 }
  0xdf   :  { %v154_v32 = vmax.f32 %v144_v30, 0.0  ;;  %369 = vmatprep.subr.bf16.mxu0 %v368_v29  ;;  %376 = vmatprep.subr.bf16.mxu1 %v368_v29 }
  0xe0   :  { %371 = vmatpush3.bf16.msra.mxu0 %v368_v29  ;;  %378 = vmatpush3.bf16.msra.mxu1 %v368_v29 }
  0xe1   :  { %v372_v33 = vpack.c.bf16 %v155_v31, %v154_v32 }
  0xe3   :  { %373 = vmatprep.subr.bf16.mxu0 %v372_v33  ;;  %377 = vmatprep.subr.bf16.mxu1 %v372_v33 }
  0xe4   :  { %375 = vmatpush3.bf16.msra.mxu0 %v372_v33  ;;  %379 = vmatpush3.bf16.msra.mxu1 %v372_v33 }
  0xe7   :  { %363 = vmatmul.mubr.msk.f32.vlgmr.msra.gmra.mrb[4].mxu0 %vm184_vm2, %v157_v34  ;;  %366 = vmatmul.mubr.msk.f32.vlgmr.msra.gmra.mrb[0].mxu1 %vm184_vm2, %v159_v35 }
 0x1ba   :  { %v364_v40 = vpop.f32.mrb[4].mxu0  ;;  %v367_v41 = vpop.f32.mrb[0].mxu1 }
 0x1bb   :  { %v269_v42 = vadd.f32 %v364_v40, %v172_v37  ;;  %v263_v43 = vpop.f32.mrb[5].mxu0  ;;  %v273_v44 = vpop.f32.mrb[1].mxu1  ;;  %v279_v45 = vadd.f32 %v367_v41, %v182_v39 }
 0x1bc   :  { %v264_v46 = vadd.f32 %v263_v43, %v167_v36  ;;  %v274_v47 = vadd.f32 %v273_v44, %v177_v38 }
 0x1bd   :  { %v283_v48 = vadd.f32 1e-07, %v269_v42  ;;  %v285_v52 = vadd.f32 1e-07, %v279_v45 }
 0x1be   :  { %v282_v49 = vadd.f32 1e-07, %v264_v46  ;;  %v284_v50 = vadd.f32 1e-07, %v274_v47 }
 0x1bf   :  { %v287_v51 = vmul.f32 %v283_v48, %v283_v48  ;;  %v289_v56 = vmul.f32 %v285_v52, %v285_v52 }
 0x1c0   :  { %v286_v53 = vmul.f32 %v282_v49, %v282_v49  ;;  %v288_v55 = vmul.f32 %v284_v50, %v284_v50 }
 0x1c2   :  { %v290_v54 = vadd.f32 %v287_v51, %v286_v53 }
 0x1c4   :  { %v291_v57 = vadd.f32 %v290_v54, %v288_v55 }
 0x1c6   :  { %v292_v58 = vadd.f32 %v291_v57, %v289_v56 }
 0x1c8   :  { %v293_v59 = vrot.slane %v292_v58, 4 }
 0x1ca   :  { %v294_v60 = vadd.f32 %v293_v59, %v292_v58 }
 0x1cc   :  { %v295_v61 = vrot.slane %v294_v60, 2 }
 0x1ce   :  { %v296_v62 = vadd.f32 %v295_v61, %v294_v60 }
 0x1d0   :  { %v297_v63 = vrot.slane %v296_v62, 1 }
 0x1d2   :  { %v298_v0 = vadd.f32 %v297_v63, %v296_v62 }
 0x1d4   :  { %386 = vrsqrt.f32 %v298_v0 }
 0x1de   :  { %v387_v1 = vpop.eup %386 }
 0x1df   :  { %v302_v2 = vmul.f32 %v387_v1, %v274_v47  ;;  %v300_v3 = vmul.f32 %v387_v1, %v264_v46  ;;  %v301_v4 = vmul.f32 %v387_v1, %v269_v42  ;;  %v303_v5 = vmul.f32 %v387_v1, %v279_v45 }
 0x1e1   :  { %306 = vst [vmem:[#allocation2 + $0x10] sm:$0xff] %v302_v2  ;;  %304 = vst [vmem:[#allocation2] sm:$0xff] %v300_v3 }
 0x1e2   :  { %305 = vst [vmem:[#allocation2 + $0x8] sm:$0xff] %v301_v4  ;;  %307 = vst [vmem:[#allocation2 + $0x18] sm:$0xff] %v303_v5 }
 0x1e3   :  { %399 = shalt.err (!%p396_p4)
}
 0x1e4   :  { %s400_s27 = scalar_lea.hbm %s522_s5, 512 }
 0x1e5   :  { %p401_p5 = scmp.ne.s32.totalorder %s522_s5, %s400_s27  ;;  %p404_p6 = scmp.lt.u32.totalorder %s400_s27, %s522_s5 }
 0x1e7   :  { %p406_p7 = pnand %p404_p6, %p401_p5 }
 0x1e9   :  { %409 = shalt.err (!%p406_p7)
}
 0x1ea   :  { %s414_s6 = smov 128   ;;  %s415_s7 = smov 8  }
 0x1eb   :  { %319 = dma.vmem_to_hbm [thread:$0]  %s314_s23, 512, %s522_s5, [#allocation3], %s414_s6, %s414_s6, %s415_s7  }
 0x1ec   :  { %410 = dma.done.wait [#allocation3], 512  }
 0x1ed   :  { %411 = vsyncadd [#allocation3], 4294966784 }
 0x1ee   :  { %323 = vsyncpa [#allocation3], 1 }

</bundles_post_ra>
